<compile_context>
chip_gen: v7x
topology: tpu7x:2x2x1
jax: 0.10.0
libtpu: 0.0.40
codegen_flags: <defaults>
</compile_context>

<pallas_src>
import functools
import math

import jax
import jax.numpy as jnp
from jax.experimental import pallas as pl
from jax.experimental.pallas import tpu as pltpu


# ------------------------------ tiling helper -------------------------------

def _tile(full, pref, align):
    """Largest tile <= pref that is a multiple of `align` and divides `full`;
    falls back to the full extent (full-extent blocks are always legal)."""
    if full <= pref:
        return full
    t = pref
    while t >= align:
        if full % t == 0 and t % align == 0:
            return t
        t -= align
    return full


# ----------------------------- Pallas kernels ------------------------------

def _matmul_kernel(x_ref, w_ref, o_ref, acc_ref):
    # tiled x @ w with f32 accumulation; bf16 operands feed the MXU.
    @pl.when(pl.program_id(2) == 0)
    def _():
        acc_ref[...] = jnp.zeros_like(acc_ref)

    acc_ref[...] += jnp.dot(
        x_ref[...].astype(jnp.bfloat16),
        w_ref[...].astype(jnp.bfloat16),
        preferred_element_type=jnp.float32)

    @pl.when(pl.program_id(2) == pl.num_programs(2) - 1)
    def _():
        o_ref[...] = acc_ref[...].astype(o_ref.dtype)


def linear(x2d, w_t, *, tm_pref=256, tn_pref=256, tk_pref=256):
    """x2d @ w_t, with w_t already stored as (in_features, out_features)."""
    M, K = x2d.shape
    N = w_t.shape[1]
    tm = _tile(M, tm_pref, 8)
    tn = _tile(N, tn_pref, 128)
    tk = _tile(K, tk_pref, 128)
    grid = (M // tm, N // tn, K // tk)
    return pl.pallas_call(
        _matmul_kernel,
        out_shape=jax.ShapeDtypeStruct((M, N), jnp.float32),
        grid=grid,
        in_specs=[pl.BlockSpec((tm, tk), lambda i, j, k: (i, k)),
                  pl.BlockSpec((tk, tn), lambda i, j, k: (k, j))],
        out_specs=pl.BlockSpec((tm, tn), lambda i, j, k: (i, j)),
        scratch_shapes=[pltpu.VMEM((tm, tn), jnp.float32)],
        compiler_params=pltpu.CompilerParams(
            dimension_semantics=("parallel", "parallel", "arbitrary")),
    )(x2d, w_t)


def _ffn_kernel(x_ref, w1_ref, w3_ref, w2_ref, o_ref, acc_ref):
    # Fused SwiGLU FFN tile: grid axis 1 walks the hidden dim, which is the
    # N-axis of w1/w3 and the K-axis of w2.  The (M, H) intermediate lives only
    # as a (tm, th) VMEM value.
    @pl.when(pl.program_id(1) == 0)
    def _():
        acc_ref[...] = jnp.zeros_like(acc_ref)

    x = x_ref[...].astype(jnp.bfloat16)
    h1 = jnp.dot(x, w1_ref[...].astype(jnp.bfloat16),
                 preferred_element_type=jnp.float32)
    h3 = jnp.dot(x, w3_ref[...].astype(jnp.bfloat16),
                 preferred_element_type=jnp.float32)
    g = (h1 * jax.nn.sigmoid(h1)) * h3
    acc_ref[...] += jnp.dot(g.astype(jnp.bfloat16),
                            w2_ref[...].astype(jnp.bfloat16),
                            preferred_element_type=jnp.float32)

    @pl.when(pl.program_id(1) == pl.num_programs(1) - 1)
    def _():
        o_ref[...] = acc_ref[...].astype(o_ref.dtype)


def feed_forward(x2d, w1_t, w2_t, w3_t):
    M, D = x2d.shape
    H = w1_t.shape[1]
    tm = _tile(M, 256, 8)
    th = _tile(H, 256, 128)
    grid = (M // tm, H // th)
    return pl.pallas_call(
        _ffn_kernel,
        out_shape=jax.ShapeDtypeStruct((M, D), jnp.float32),
        grid=grid,
        in_specs=[pl.BlockSpec((tm, D), lambda i, k: (i, 0)),
                  pl.BlockSpec((D, th), lambda i, k: (0, k)),
                  pl.BlockSpec((D, th), lambda i, k: (0, k)),
                  pl.BlockSpec((th, D), lambda i, k: (k, 0))],
        out_specs=pl.BlockSpec((tm, D), lambda i, k: (i, 0)),
        scratch_shapes=[pltpu.VMEM((tm, D), jnp.float32)],
        compiler_params=pltpu.CompilerParams(
            dimension_semantics=("parallel", "arbitrary")),
    )(x2d, w1_t, w3_t, w2_t)


def _rmsnorm_kernel(x_ref, w_ref, o_ref, *, eps):
    x = x_ref[...].astype(jnp.float32)
    ms = jnp.mean(x * x, axis=-1, keepdims=True)
    o_ref[...] = (x * jax.lax.rsqrt(ms + eps) * w_ref[...]).astype(o_ref.dtype)


def rmsnorm(x2d, w, eps, *, block_rows=512):
    M, D = x2d.shape
    tm = _tile(M, block_rows, 8)
    return pl.pallas_call(
        functools.partial(_rmsnorm_kernel, eps=eps),
        out_shape=jax.ShapeDtypeStruct((M, D), x2d.dtype),
        grid=(M // tm,),
        in_specs=[pl.BlockSpec((tm, D), lambda i: (i, 0)),
                  pl.BlockSpec((1, D), lambda i: (0, 0))],
        out_specs=pl.BlockSpec((tm, D), lambda i: (i, 0)),
        compiler_params=pltpu.CompilerParams(dimension_semantics=("parallel",)),
    )(x2d, w.reshape(1, D))


def _add_rmsnorm_kernel(x_ref, r_ref, w_ref, h_ref, y_ref, *, eps):
    # fused residual add + rmsnorm: h = x + r ; y = rmsnorm(h) * w
    h = x_ref[...].astype(jnp.float32) + r_ref[...].astype(jnp.float32)
    ms = jnp.mean(h * h, axis=-1, keepdims=True)
    h_ref[...] = h.astype(h_ref.dtype)
    y_ref[...] = (h * jax.lax.rsqrt(ms + eps) * w_ref[...]).astype(y_ref.dtype)


def add_rmsnorm(x2d, r2d, w, eps, *, block_rows=512):
    M, D = x2d.shape
    tm = _tile(M, block_rows, 8)
    return pl.pallas_call(
        functools.partial(_add_rmsnorm_kernel, eps=eps),
        out_shape=(jax.ShapeDtypeStruct((M, D), jnp.float32),
                   jax.ShapeDtypeStruct((M, D), jnp.float32)),
        grid=(M // tm,),
        in_specs=[pl.BlockSpec((tm, D), lambda i: (i, 0)),
                  pl.BlockSpec((tm, D), lambda i: (i, 0)),
                  pl.BlockSpec((1, D), lambda i: (0, 0))],
        out_specs=(pl.BlockSpec((tm, D), lambda i: (i, 0)),
                   pl.BlockSpec((tm, D), lambda i: (i, 0))),
        compiler_params=pltpu.CompilerParams(dimension_semantics=("parallel",)),
    )(x2d, r2d, w.reshape(1, D))


def _attn_kernel(q_ref, k_ref, v_ref, m_ref, o_ref, *, n_heads, head_dim, scale):
    # One batch per grid cell; all heads packed on the lane axis.  q/k/v are
    # (S, n_heads*head_dim) / (kv, n_heads*head_dim) slabs — no transposes.
    q = q_ref[0]            # (S, D)
    k = k_ref[0]            # (kv, D)
    v = v_ref[0]            # (kv, D)
    mask = m_ref[...]       # (S, kv), f32 (-inf above the diagonal)

    outs = []
    for hh in range(n_heads):
        lo, hi = hh * head_dim, (hh + 1) * head_dim
        qh = q[:, lo:hi].astype(jnp.bfloat16)
        kh = k[:, lo:hi].astype(jnp.bfloat16)
        vh = v[:, lo:hi].astype(jnp.bfloat16)
        s = jax.lax.dot_general(qh, kh, (((1,), (1,)), ((), ())),
                                preferred_element_type=jnp.float32) * scale
        s = s + mask
        s = s - jnp.max(s, axis=-1, keepdims=True)
        p = jnp.exp(s)
        p = p * pl.reciprocal(jnp.sum(p, axis=-1, keepdims=True), approx=True)
        outs.append(jnp.dot(p.astype(jnp.bfloat16), vh,
                            preferred_element_type=jnp.float32))
    o_ref[0] = jnp.concatenate(outs, axis=-1).astype(o_ref.dtype)


def attention_core(q, k, v, mask2d, n_heads, head_dim):
    bsz, S, D = q.shape
    kv = k.shape[1]
    scale = 1.0 / math.sqrt(head_dim)
    return pl.pallas_call(
        functools.partial(_attn_kernel, n_heads=n_heads, head_dim=head_dim,
                          scale=scale),
        out_shape=jax.ShapeDtypeStruct((bsz, S, D), jnp.float32),
        grid=(bsz,),
        in_specs=[pl.BlockSpec((1, S, D), lambda b: (b, 0, 0)),
                  pl.BlockSpec((1, kv, D), lambda b: (b, 0, 0)),
                  pl.BlockSpec((1, kv, D), lambda b: (b, 0, 0)),
                  pl.BlockSpec((S, kv), lambda b: (0, 0))],
        out_specs=pl.BlockSpec((1, S, D), lambda b: (b, 0, 0)),
        compiler_params=pltpu.CompilerParams(dimension_semantics=("parallel",)),
    )(q, k, v, mask2d)


# ------------------------------- JAX glue -----------------------------------

def precompute_freqs_cis(head_dim, end, theta=10000.0):
    freqs = 1.0 / theta ** (
        jnp.arange(0, head_dim, 2)[: head_dim // 2].astype(jnp.float32) / head_dim)
    t = jnp.arange(end, dtype=jnp.float32)
    freqs = jnp.outer(t, freqs)
    return jnp.stack([jnp.cos(freqs), jnp.sin(freqs)], axis=-1)  # (end, hd//2, 2)


def apply_rotary(xq, xk, freqs_cis):
    # complex multiplication of interleaved (real, imag) pairs == matmul_complex
    bsz, S, nh, hd = xq.shape
    f = freqs_cis.reshape(1, S, 1, hd // 2, 2)
    cos, sin = f[..., 0], f[..., 1]

    def rot(x):
        x_ = x.astype(jnp.float32).reshape(bsz, S, nh, hd // 2, 2)
        xr, xi = x_[..., 0], x_[..., 1]
        out = jnp.stack([xr * cos - xi * sin, xr * sin + xi * cos], axis=-1)
        return out.reshape(bsz, S, nh, hd).astype(x.dtype)

    return rot(xq), rot(xk)


def transformer_block(x, lp, layer_idx, start_pos, freqs_cis, mask2d,
                      hidden_state, cfg):
    bsz, S, dim = x.shape
    n_heads, head_dim = cfg["n_heads"], cfg["head_dim"]
    eps = cfg["norm_eps"]
    M = bsz * S

    # ---- attention ----
    xn = rmsnorm(x.reshape(M, dim), lp["attn_norm"], eps)
    qkv = linear(xn, lp["wqkv_t"])                       # fused Q|K|V: (M, 3*dim)
    xq = qkv[:, :dim].reshape(bsz, S, n_heads, head_dim)
    xk = qkv[:, dim:2 * dim].reshape(bsz, S, n_heads, head_dim)
    xv = qkv[:, 2 * dim:].reshape(bsz, S, n_heads, head_dim)
    xq, xk = apply_rotary(xq, xk, freqs_cis)

    # in-place-style KV-cache update: one dynamic_update_slice per layer
    kv_new = jnp.stack([xk, xv], axis=0)[None]           # (1, 2, bsz, S, nh, hd)
    hidden_state = jax.lax.dynamic_update_slice(
        hidden_state, kv_new, (layer_idx, 0, 0, start_pos, 0, 0))

    kv_len = start_pos + S
    keys = hidden_state[layer_idx, 0, :bsz, :kv_len].reshape(bsz, kv_len, dim)
    values = hidden_state[layer_idx, 1, :bsz, :kv_len].reshape(bsz, kv_len, dim)
    q = xq.reshape(bsz, S, dim)                          # heads stay on the lane axis

    attn = attention_core(q, keys, values, mask2d, n_heads, head_dim)   # (bsz,S,dim)
    attn = linear(attn.reshape(M, dim), lp["wo_t"])                     # (M, dim)

    # ---- feed-forward (residual add fused into the second norm) ----
    h, hn = add_rmsnorm(x.reshape(M, dim), attn, lp["ffn_norm"], eps)
    ffn = feed_forward(hn, lp["w1_t"], lp["w2_t"], lp["w3_t"])
    out = (h + ffn).reshape(bsz, S, dim)
    return out, hidden_state


def transformer_forward(params, cfg, tokens, start_pos, mask, hidden_state):
    bsz, S = tokens.shape
    dim = cfg["dim"]
    kv_len = start_pos + S

    h = jnp.take(params["tok_embeddings"], tokens, axis=0)   # embedding lookup
    freqs_cis = params["freqs_cis"][start_pos:start_pos + S]
    mask2d = jnp.broadcast_to(mask, (bsz, cfg["n_heads"], S, kv_len))[0, 0]

    for i in range(cfg["n_layers"]):
        h, hidden_state = transformer_block(h, params["layers"][i], i, start_pos,
                                            freqs_cis, mask2d, hidden_state, cfg)

    # last-token slice BEFORE the final norm + lm head (rmsnorm is per-row, so
    # this is mathematically identical to norm-then-slice).
    hl = h[:, -1, :]                                         # (bsz, dim)
    hl = rmsnorm(hl, params["norm"], cfg["norm_eps"])
    logits = linear(hl, params["output_t"])                  # (bsz, vocab)

    new_hidden = hidden_state
    if bsz != hidden_state.shape[2]:
        new_hidden = hidden_state[:, :, :bsz]
    return logits.astype(jnp.float32), new_hidden


# ----------------------------- parameter init -------------------------------

def init_params(cfg, key):
    dim, n_layers = cfg["dim"], cfg["n_layers"]
    vocab = cfg["vocab_size"]
    hidden_dim = 4 * dim
    hidden_dim = int(2 * hidden_dim / 3)
    hidden_dim = cfg["multiple_of"] * (
        (hidden_dim + cfg["multiple_of"] - 1) // cfg["multiple_of"])
    cfg["hidden_dim"] = hidden_dim

    keys = jax.random.split(key, 2 + n_layers)
    params = {
        "tok_embeddings": 0.02 * jax.random.normal(keys[0], (vocab, dim), jnp.float32),
        # weights stored pre-transposed (in, out) so no per-forward .T
        "output_t": 0.02 * jax.random.normal(keys[1], (dim, vocab), jnp.float32),
        "norm": jnp.ones((dim,), jnp.float32),
        "freqs_cis": precompute_freqs_cis(cfg["head_dim"], cfg["max_seq_len"] * 2),
        "layers": [],
    }
    for i in range(n_layers):
        lk = jax.random.split(keys[2 + i], 5)
        params["layers"].append({
            "wqkv_t": 0.02 * jax.random.normal(lk[0], (dim, 3 * dim), jnp.float32),
            "wo_t":   0.02 * jax.random.normal(lk[1], (dim, dim), jnp.float32),
            "w1_t":   0.02 * jax.random.normal(lk[2], (dim, hidden_dim), jnp.float32),
            "w2_t":   0.02 * jax.random.normal(lk[3], (hidden_dim, dim), jnp.float32),
            "w3_t":   0.02 * jax.random.normal(lk[4], (dim, hidden_dim), jnp.float32),
            "attn_norm": jnp.ones((dim,), jnp.float32),
            "ffn_norm": jnp.ones((dim,), jnp.float32),
        })
    return params


# ---------------------------------- main -------------------------------------

if __name__ == "__main__":
    cfg = dict(dim=32, n_layers=2, n_heads=4, vocab_size=64, multiple_of=16,
               norm_eps=1e-5, max_batch_size=2, max_seq_len=16)
    cfg["head_dim"] = cfg["dim"] // cfg["n_heads"]

    key = jax.random.PRNGKey(0)
    pkey, tkey = jax.random.split(key)
    params = init_params(cfg, pkey)

    bsz, seqlen = 2, 8
    start_pos = 0  # static (torch passes a scalar tensor used as an index)
    tokens = jax.random.randint(tkey, (bsz, seqlen), 0, cfg["vocab_size"], jnp.int32)

    kv_len = start_pos + seqlen
    mask = jnp.triu(jnp.full((seqlen, kv_len), float("-inf"), jnp.float32),
                    k=start_pos + 1).reshape(1, 1, seqlen, kv_len)

    hidden_state = jnp.zeros(
        (cfg["n_layers"], 2, cfg["max_batch_size"], cfg["max_seq_len"],
         cfg["n_heads"], cfg["head_dim"]), jnp.float32)

    logits, new_hidden = transformer_forward(params, cfg, tokens, start_pos,
                                             mask, hidden_state)
    jax.block_until_ready(logits)
    jax.block_until_ready(new_hidden)

    assert logits.shape == (bsz, cfg["vocab_size"]) and logits.dtype == jnp.float32
    assert new_hidden.shape == hidden_state.shape
    print("KERNEL_OK")
</pallas_src>

<mosaic_0001>
module attributes {stable_mosaic.version = 11 : i64} {
  func.func @_rmsnorm_kernel(%arg0: i32, %arg1: memref<16x32xf32, #tpu.memory_space<vmem>>, %arg2: memref<1x32xf32, #tpu.memory_space<vmem>>, %arg3: memref<16x32xf32, #tpu.memory_space<vmem>>) attributes {dimension_semantics = [#tpu.dimension_semantics<parallel>], iteration_bounds = array<i64: 1>, scalar_prefetch = 0 : i64, scratch_operands = 0 : i64, tpu.core_type = #tpu.core_type<tc>, window_params = [{transform_indices = @transform_0, window_bounds = array<i64: 16, 32>}, {pipeline_mode = #tpu.pipeline_mode<synchronous>, transform_indices = @transform_1, window_bounds = array<i64: 1, 32>}, {transform_indices = @transform_2, window_bounds = array<i64: 16, 32>}]} {
    %c0 = arith.constant 0 : index
    %c0_0 = arith.constant 0 : index
    %0 = vector.load %arg1[%c0, %c0_0] : memref<16x32xf32, #tpu.memory_space<vmem>>, vector<16x32xf32>
    %1 = arith.mulf %0, %0 : vector<16x32xf32>
    %cst = arith.constant dense<0.000000e+00> : vector<16xf32>
    %2 = vector.multi_reduction <add>, %1, %cst [1] : vector<16x32xf32> to vector<16xf32>
    %3 = vector.shape_cast %2 : vector<16xf32> to vector<16x1xf32>
    %cst_1 = arith.constant 3.200000e+01 : f32
    %4 = vector.broadcast %cst_1 : f32 to vector<16x1xf32>
    %5 = arith.divf %3, %4 : vector<16x1xf32>
    %cst_2 = arith.constant 9.99999974E-6 : f32
    %6 = vector.broadcast %cst_2 : f32 to vector<16x1xf32>
    %7 = arith.addf %5, %6 : vector<16x1xf32>
    %8 = math.rsqrt %7 : vector<16x1xf32>
    %9 = vector.broadcast %8 : vector<16x1xf32> to vector<16x32xf32>
    %10 = arith.mulf %0, %9 : vector<16x32xf32>
    %c0_3 = arith.constant 0 : index
    %c0_4 = arith.constant 0 : index
    %11 = vector.load %arg2[%c0_3, %c0_4] : memref<1x32xf32, #tpu.memory_space<vmem>>, vector<1x32xf32>
    %12 = vector.broadcast %11 : vector<1x32xf32> to vector<16x32xf32>
    %13 = arith.mulf %10, %12 : vector<16x32xf32>
    %c0_5 = arith.constant 0 : index
    %c0_6 = arith.constant 0 : index
    %14 = vector.load %arg3[%c0_5, %c0_6] : memref<16x32xf32, #tpu.memory_space<vmem>>, vector<16x32xf32>
    tpu.vector_store %arg3[%c0_5, %c0_6], %13 {strides = array<i32>} : memref<16x32xf32, #tpu.memory_space<vmem>>, vector<16x32xf32>,
    return
  }
  func.func @transform_0(%arg0: i32) -> (i32, i32) {
    %c0_i32 = arith.constant 0 : i32
    %c0_i32_0 = arith.constant 0 : i32
    return %arg0, %c0_i32 : i32, i32
  }
  func.func @transform_1(%arg0: i32) -> (i32, i32) {
    %c0_i32 = arith.constant 0 : i32
    %c0_i32_0 = arith.constant 0 : i32
    %c0_i32_1 = arith.constant 0 : i32
    return %c0_i32, %c0_i32_0 : i32, i32
  }
  func.func @transform_2(%arg0: i32) -> (i32, i32) {
    %c0_i32 = arith.constant 0 : i32
    %c0_i32_0 = arith.constant 0 : i32
    return %arg0, %c0_i32 : i32, i32
  }
}

</mosaic_0001>

<bundles_post_ra>
// kernel: tpu_custom_call.1
= control target key start
LH: loop header
LB: loop body
LE: loop exit
PB: predicated region body
PF: predicated region fallthrough
CT: control target
= control target key end

     0   :  { %7 = vsyncpa [#allocation3], 0  ;;  %s187_s0 = inlined_call_operand.hbm [shape: f32[16,32], index: 0, kind: input, shape index: {}]   ;;  %s188_s1 = inlined_call_operand.vmem [shape: f32[1,32], index: 1, kind: input, shape index: {}]   ;;  %s189_s2 = inlined_call_operand.hbm [shape: f32[16,32], index: 2, kind: output, shape index: {}]  }
   0x1   :  { %8 = vsyncpa [#allocation4], 0  ;;  %s131_s9 = smov [#allocation2]   ;;  %s83_s13 = scalar_lea.hbm %s187_s0, 256 }
   0x2   :  { %s14_s10 = sshll.u32 %s131_s9, 4  ;;  %p84_p0 = scmp.ne.s32.totalorder %s187_s0, %s83_s13  ;;  %s15_s10 = int_to_ptr.vmem [resolvable:$true] %s14_s10 }
   0x3   :  { %p87_p1 = scmp.lt.u32.totalorder %s83_s13, %s187_s0 }
   0x5   :  { %p89_p2 = pnand %p87_p1, %p84_p0 }
   0x7   :  { %92 = shalt.err (!%p89_p2)
}
   0x8   :  { %s93_s18 = scalar_lea.vmem %s15_s10, 256  ;;  %p98_p4 = scmp.lt.s32.totalorder %s15_s10, %s15_s10 }
   0x9   :  { %p94_p3 = scmp.ne.s32.totalorder %s15_s10, %s93_s18  ;;  %p99_p5 = scmp.lt.s32.totalorder %s93_s18, %s93_s18 }
   0xb   :  { %p100_p6 = por %p99_p5, %p98_p4 }
   0xd   :  { %p101_p7 = pnand %p100_p6, %p94_p3 }
   0xf   :  { %104 = shalt.err (!%p101_p7)
}
  0x10   :  { %s132_s19 = smov 128   ;;  %s133_s20 = smov 8  }
  0x11   :  { %20 = dma.hbm_to_vmem [thread:$0]  %s187_s0, 256, %s15_s10, [#allocation3], %s132_s19, %s132_s19, %s133_s20  }
  0x12   :  { %127 = dma.done.wait [#allocation3], 256  }
  0x13   :  { %128 = vsyncadd [#allocation3], 4294967040  ;;  %v26_v0 = vld [vmem:[#allocation2] sm:$0xff]  ;;  %vm30_vm0 = vcmask 261120   ;;  %v27_v1 = vld [vmem:[#allocation2 + $0x8] sm:$0xff]  ;;  %s134_s24 = smov [#allocation5]  }
  0x14   :  { %v28_v2 = vmul.f32 %v26_v0, %v26_v0  ;;  %v29_v3 = vmul.f32 %v27_v1, %v27_v1  ;;  %v74_v13 = vld [vmem:[%s188_s1] ss:$0 sm:$0xff]  ;;  %s62_s25 = sshll.u32 %s134_s24, 4  ;;  %s63_s25 = int_to_ptr.vmem [resolvable:$true] %s62_s25 }
  0x15   :  { %s105_s26 = scalar_lea.vmem %s63_s25, 256  ;;  %p110_p9 = scmp.lt.s32.totalorder %s63_s25, %s63_s25 }
  0x16   :  { %v31_v4 = vsel %vm30_vm0, %v28_v2, 0.0  ;;  %v34_v5 = vsel %vm30_vm0, %v29_v3, 0.0  ;;  %p106_p8 = scmp.ne.s32.totalorder %s63_s25, %s105_s26  ;;  %p111_p10 = scmp.lt.s32.totalorder %s105_s26, %s105_s26 }
  0x17   :  { %32 = vadd.xlane.f32.xlu0 %v31_v4 }
  0x18   :  { %p112_p11 = por %p111_p10, %p110_p9 }
  0x1a   :  { %p113_p12 = pnand %p112_p11, %p106_p8 }
  0x1b   :  { %35 = vadd.xlane.f32.xlu0 %v34_v5 }
  0xa4   :  { %v33_v6 = vpop.xlane.xlu0 %32 }
  0xa5   :  { %v38_v7 = vmul.f32 0.03125, %v33_v6 }
  0xa7   :  { %v40_v8 = vadd.f32 1e-05, %v38_v7 }
  0xa8   :  { %v36_v9 = vpop.xlane.xlu0 %35 }
  0xa9   :  { %79 = vrsqrt.f32 %v40_v8  ;;  %v39_v10 = vmul.f32 0.03125, %v36_v9 }
  0xab   :  { %v41_v11 = vadd.f32 1e-05, %v39_v10 }
  0xad   :  { %81 = vrsqrt.f32 %v41_v11 }
  0xb3   :  { %v80_v12 = vpop.eup %79 }
  0xb4   :  { %v44_v14 = vmul.f32 %v80_v12, %v26_v0 }
  0xb6   :  { %v53_v15 = vmul.f32 %v74_v13, %v44_v14 }
  0xb7   :  { %v82_v16 = vpop.eup %81 }
  0xb8   :  { %v45_v17 = vmul.f32 %v82_v16, %v27_v1  ;;  %55 = vst.msk [vmem:[#allocation5] sm:$0xff] %vm30_vm0, %v53_v15 }
  0xba   :  { %v54_v18 = vmul.f32 %v74_v13, %v45_v17 }
  0xbc   :  { %56 = vst.msk [vmem:[#allocation5 + $0x8] sm:$0xff] %vm30_vm0, %v54_v18 }
  0xbd   :  { %116 = shalt.err (!%p113_p12)
}
  0xbe   :  { %s117_s28 = scalar_lea.hbm %s189_s2, 256 }
  0xbf   :  { %p118_p13 = scmp.ne.s32.totalorder %s189_s2, %s117_s28  ;;  %p121_p0 = scmp.lt.u32.totalorder %s117_s28, %s189_s2 }
  0xc1   :  { %p123_p1 = pnand %p121_p0, %p118_p13 }
  0xc3   :  { %126 = shalt.err (!%p123_p1)
}
  0xc4   :  { %68 = dma.vmem_to_hbm [thread:$0]  %s63_s25, 256, %s189_s2, [#allocation4], %s132_s19, %s132_s19, %s133_s20  }
  0xc5   :  { %129 = dma.done.wait [#allocation4], 256  }
  0xc6   :  { %130 = vsyncadd [#allocation4], 4294967040 }
  0xc7   :  { %72 = vsyncpa [#allocation3], 1 }
  0xc8   :  { %73 = vsyncpa [#allocation4], 1 }

</bundles_post_ra>
